<compile_context>
chip_gen: v5e
topology: v5e:2x2
jax: 0.10.0
libtpu: 0.0.40
codegen_flags: <defaults>
</compile_context>

<pallas_src>
import functools

import jax
import jax.numpy as jnp
from jax.experimental import pallas as pl
from jax.experimental.pallas import tpu as pltpu

LANES = 128   # lane width of a vreg
S_MAX = 512   # sublane-group tile: (9, 512, 128) f32 = 2.25 MiB per block;
              # in + out double-buffered ~ 9 MiB VMEM (well under scoped limit)


def _physics_kernel(params_ref, f_ref, o_ref):
    """params_ref: SMEM (2,) = [mu, la] (precomputed Lame parameters).
    f_ref / o_ref: VMEM (9, S, 128) component-major F / Kirchhoff-stress blocks."""
    mu = params_ref[0]
    la = params_ref[1]

    def row(i, j):
        # F[:, i, j] for the current batch block: dense (S, 128) plane.
        return f_ref[3 * i + j]

    # Shared diagonal additive term: la * (trace(F) - 3) - 2 * mu.
    trace = row(0, 0) + row(1, 1) + row(2, 2)
    diag_add = la * (trace - 3.0) - 2.0 * mu

    # pk_stress is symmetric -> compute only the 6 unique (S, 128) planes.
    #   pk[i, k] = mu * (F[i, k] + F[k, i])            (i != k)
    #   pk[i, i] = 2 * mu * F[i, i] + la*(tr-3) - 2*mu
    pk = {}
    for i in range(3):
        pk[(i, i)] = 2.0 * mu * row(i, i) + diag_add
        for k in range(i + 1, 3):
            pk[(i, k)] = mu * (row(i, k) + row(k, i))

    def pk_at(i, k):
        return pk[(i, k)] if i <= k else pk[(k, i)]

    # kirchhoff[i, j] = sum_k pk[i, k] * F[j, k]   (= pk_stress @ F^T)
    for i in range(3):
        for j in range(3):
            o_ref[3 * i + j] = (pk_at(i, 0) * row(j, 0)
                                + pk_at(i, 1) * row(j, 1)
                                + pk_at(i, 2) * row(j, 2))


@jax.jit
def physics_forward(F, youngs_modulus_log, poissons_ratio_sigmoid):
    """F: (B, 3, 3) float32 -> Kirchhoff stress (B, 3, 3) float32."""
    F = F.astype(jnp.float32)
    B = F.shape[0]

    # Batch tiling: 128 lanes x S sublane-groups per grid step.
    nb = max(1, pl.cdiv(B, LANES))       # number of 128-wide lane groups
    S = min(S_MAX, nb)                   # full array (small B) or multiple of 8
    nb_pad = pl.cdiv(nb, S) * S          # pad group count to a multiple of S
    Bp = nb_pad * LANES

    # (B, 3, 3) -> (9, Bp) component-major -> free contiguous reshape to 3-D.
    # TODO(synk): if the producer/consumer can keep F component-major (9, B) in
    # HBM, these layout transposes (extra HBM passes) can be dropped entirely.
    Fc = jnp.transpose(F.reshape(B, 9), (1, 0))
    Fc = jnp.pad(Fc, ((0, 0), (0, Bp - B))).reshape(9, nb_pad, LANES)

    # Lame parameters computed once outside the kernel (no in-kernel exp/sigmoid).
    E = jnp.exp(jnp.asarray(youngs_modulus_log, jnp.float32))
    nu = jax.nn.sigmoid(jnp.asarray(poissons_ratio_sigmoid, jnp.float32)) * 0.49
    mu = E / (2.0 * (1.0 + nu))
    la = E * nu / ((1.0 + nu) * (1.0 - 2.0 * nu))
    params = jnp.stack([mu, la]).astype(jnp.float32)

    out = pl.pallas_call(
        _physics_kernel,
        out_shape=jax.ShapeDtypeStruct((9, nb_pad, LANES), jnp.float32),
        grid_spec=pltpu.PrefetchScalarGridSpec(
            num_scalar_prefetch=0,
            grid=(nb_pad // S,),
            in_specs=[
                pl.BlockSpec(memory_space=pltpu.MemorySpace.SMEM),
                pl.BlockSpec((9, S, LANES), lambda b: (0, b, 0)),
            ],
            out_specs=pl.BlockSpec((9, S, LANES), lambda b: (0, b, 0)),
        ),
        compiler_params=pltpu.CompilerParams(
            dimension_semantics=("parallel",),
            vmem_limit_bytes=32 * 1024 * 1024,
        ),
        # The component-major F slab is a wrapper temporary with the same shape
        # and dtype as the output -> reuse its HBM buffer for the result.
        input_output_aliases={1: 0},
    )(params, Fc)

    out = out.reshape(9, Bp)[:, :B]
    return jnp.transpose(out, (1, 0)).reshape(B, 3, 3)


def physics_reference(F, youngs_modulus_log, poissons_ratio_sigmoid):
    """Pure-JAX reference mirroring the PyTorch forward."""
    E = jnp.exp(youngs_modulus_log)
    nu = jax.nn.sigmoid(poissons_ratio_sigmoid) * 0.49
    mu = E / (2.0 * (1.0 + nu))
    la = E * nu / ((1.0 + nu) * (1.0 - 2.0 * nu))
    I = jnp.eye(3, dtype=F.dtype)[None]
    Ft = jnp.swapaxes(F, 1, 2)
    F_trace = jnp.trace(F, axis1=1, axis2=2).reshape(-1, 1, 1)
    pk = mu * (F + Ft - 2.0 * I) + la * (F_trace - 3.0) * I
    return jnp.matmul(pk, Ft)


if __name__ == "__main__":
    # Deterministic "trainable" parameters (module __init__ defaults).
    youngs_modulus_log = 10.0       # E = exp(10) ~ 2.2e4
    poissons_ratio_sigmoid = 0.0    # nu = 0.5 * 0.49 = 0.245

    key = jax.random.PRNGKey(0)
    B = 8
    # Deformation gradients near identity.
    F = jnp.eye(3, dtype=jnp.float32)[None] + 0.05 * jax.random.normal(
        key, (B, 3, 3), dtype=jnp.float32)

    out = physics_forward(F, youngs_modulus_log, poissons_ratio_sigmoid)
    out = jax.block_until_ready(out)

    ref = physics_reference(F, jnp.float32(youngs_modulus_log),
                            jnp.float32(poissons_ratio_sigmoid))
    assert out.shape == (B, 3, 3)
    assert jnp.allclose(out, ref, rtol=1e-5, atol=1e-3), (
        f"max abs err {jnp.max(jnp.abs(out - ref))}")

    print("KERNEL_OK")
</pallas_src>

<mosaic_0001>
module attributes {stable_mosaic.version = 11 : i64} {
  func.func @_physics_kernel(%arg0: i32, %arg1: memref<2xf32, #tpu.memory_space<smem>>, %arg2: memref<9x1x128xf32, #tpu.memory_space<vmem>>, %arg3: memref<9x1x128xf32, #tpu.memory_space<vmem>>) attributes {dimension_semantics = [#tpu.dimension_semantics<parallel>], iteration_bounds = array<i64: 1>, scalar_prefetch = 0 : i64, scratch_operands = 0 : i64, tpu.core_type = #tpu.core_type<tc>, window_params = [{transform_indices = @transform_0, window_bounds = array<i64: 2>}, {transform_indices = @transform_1, window_bounds = array<i64: 9, 1, 128>}, {transform_indices = @transform_2, window_bounds = array<i64: 9, 1, 128>}]} {
    %c0 = arith.constant 0 : index
    %0 = memref.load %arg1[%c0] : memref<2xf32, #tpu.memory_space<smem>>
    %c1 = arith.constant 1 : index
    %1 = memref.load %arg1[%c1] : memref<2xf32, #tpu.memory_space<smem>>
    %c0_0 = arith.constant 0 : index
    %c0_1 = arith.constant 0 : index
    %c0_2 = arith.constant 0 : index
    %2 = vector.load %arg2[%c0_0, %c0_1, %c0_2] : memref<9x1x128xf32, #tpu.memory_space<vmem>>, vector<1x1x128xf32>
    %3 = vector.shape_cast %2 : vector<1x1x128xf32> to vector<1x128xf32>
    %c4 = arith.constant 4 : index
    %c0_3 = arith.constant 0 : index
    %c0_4 = arith.constant 0 : index
    %4 = vector.load %arg2[%c4, %c0_3, %c0_4] : memref<9x1x128xf32, #tpu.memory_space<vmem>>, vector<1x1x128xf32>
    %5 = vector.shape_cast %4 : vector<1x1x128xf32> to vector<1x128xf32>
    %6 = arith.addf %3, %5 : vector<1x128xf32>
    %c8 = arith.constant 8 : index
    %c0_5 = arith.constant 0 : index
    %c0_6 = arith.constant 0 : index
    %7 = vector.load %arg2[%c8, %c0_5, %c0_6] : memref<9x1x128xf32, #tpu.memory_space<vmem>>, vector<1x1x128xf32>
    %8 = vector.shape_cast %7 : vector<1x1x128xf32> to vector<1x128xf32>
    %9 = arith.addf %6, %8 : vector<1x128xf32>
    %cst = arith.constant 3.000000e+00 : f32
    %10 = vector.broadcast %cst : f32 to vector<1x128xf32>
    %11 = arith.subf %9, %10 : vector<1x128xf32>
    %12 = vector.broadcast %1 : f32 to vector<1x128xf32>
    %13 = arith.mulf %12, %11 : vector<1x128xf32>
    %cst_7 = arith.constant 2.000000e+00 : f32
    %14 = arith.mulf %cst_7, %0 : f32
    %15 = vector.broadcast %14 : f32 to vector<1x128xf32>
    %16 = arith.subf %13, %15 : vector<1x128xf32>
    %cst_8 = arith.constant 2.000000e+00 : f32
    %17 = arith.mulf %cst_8, %0 : f32
    %c0_9 = arith.constant 0 : index
    %c0_10 = arith.constant 0 : index
    %c0_11 = arith.constant 0 : index
    %18 = vector.load %arg2[%c0_9, %c0_10, %c0_11] : memref<9x1x128xf32, #tpu.memory_space<vmem>>, vector<1x1x128xf32>
    %19 = vector.shape_cast %18 : vector<1x1x128xf32> to vector<1x128xf32>
    %20 = vector.broadcast %17 : f32 to vector<1x128xf32>
    %21 = arith.mulf %20, %19 : vector<1x128xf32>
    %22 = arith.addf %21, %16 : vector<1x128xf32>
    %c1_12 = arith.constant 1 : index
    %c0_13 = arith.constant 0 : index
    %c0_14 = arith.constant 0 : index
    %23 = vector.load %arg2[%c1_12, %c0_13, %c0_14] : memref<9x1x128xf32, #tpu.memory_space<vmem>>, vector<1x1x128xf32>
    %24 = vector.shape_cast %23 : vector<1x1x128xf32> to vector<1x128xf32>
    %c3 = arith.constant 3 : index
    %c0_15 = arith.constant 0 : index
    %c0_16 = arith.constant 0 : index
    %25 = vector.load %arg2[%c3, %c0_15, %c0_16] : memref<9x1x128xf32, #tpu.memory_space<vmem>>, vector<1x1x128xf32>
    %26 = vector.shape_cast %25 : vector<1x1x128xf32> to vector<1x128xf32>
    %27 = arith.addf %24, %26 : vector<1x128xf32>
    %28 = vector.broadcast %0 : f32 to vector<1x128xf32>
    %29 = arith.mulf %28, %27 : vector<1x128xf32>
    %c2 = arith.constant 2 : index
    %c0_17 = arith.constant 0 : index
    %c0_18 = arith.constant 0 : index
    %30 = vector.load %arg2[%c2, %c0_17, %c0_18] : memref<9x1x128xf32, #tpu.memory_space<vmem>>, vector<1x1x128xf32>
    %31 = vector.shape_cast %30 : vector<1x1x128xf32> to vector<1x128xf32>
    %c6 = arith.constant 6 : index
    %c0_19 = arith.constant 0 : index
    %c0_20 = arith.constant 0 : index
    %32 = vector.load %arg2[%c6, %c0_19, %c0_20] : memref<9x1x128xf32, #tpu.memory_space<vmem>>, vector<1x1x128xf32>
    %33 = vector.shape_cast %32 : vector<1x1x128xf32> to vector<1x128xf32>
    %34 = arith.addf %31, %33 : vector<1x128xf32>
    %35 = vector.broadcast %0 : f32 to vector<1x128xf32>
    %36 = arith.mulf %35, %34 : vector<1x128xf32>
    %cst_21 = arith.constant 2.000000e+00 : f32
    %37 = arith.mulf %cst_21, %0 : f32
    %c4_22 = arith.constant 4 : index
    %c0_23 = arith.constant 0 : index
    %c0_24 = arith.constant 0 : index
    %38 = vector.load %arg2[%c4_22, %c0_23, %c0_24] : memref<9x1x128xf32, #tpu.memory_space<vmem>>, vector<1x1x128xf32>
    %39 = vector.shape_cast %38 : vector<1x1x128xf32> to vector<1x128xf32>
    %40 = vector.broadcast %37 : f32 to vector<1x128xf32>
    %41 = arith.mulf %40, %39 : vector<1x128xf32>
    %42 = arith.addf %41, %16 : vector<1x128xf32>
    %c5 = arith.constant 5 : index
    %c0_25 = arith.constant 0 : index
    %c0_26 = arith.constant 0 : index
    %43 = vector.load %arg2[%c5, %c0_25, %c0_26] : memref<9x1x128xf32, #tpu.memory_space<vmem>>, vector<1x1x128xf32>
    %44 = vector.shape_cast %43 : vector<1x1x128xf32> to vector<1x128xf32>
    %c7 = arith.constant 7 : index
    %c0_27 = arith.constant 0 : index
    %c0_28 = arith.constant 0 : index
    %45 = vector.load %arg2[%c7, %c0_27, %c0_28] : memref<9x1x128xf32, #tpu.memory_space<vmem>>, vector<1x1x128xf32>
    %46 = vector.shape_cast %45 : vector<1x1x128xf32> to vector<1x128xf32>
    %47 = arith.addf %44, %46 : vector<1x128xf32>
    %48 = vector.broadcast %0 : f32 to vector<1x128xf32>
    %49 = arith.mulf %48, %47 : vector<1x128xf32>
    %cst_29 = arith.constant 2.000000e+00 : f32
    %50 = arith.mulf %cst_29, %0 : f32
    %c8_30 = arith.constant 8 : index
    %c0_31 = arith.constant 0 : index
    %c0_32 = arith.constant 0 : index
    %51 = vector.load %arg2[%c8_30, %c0_31, %c0_32] : memref<9x1x128xf32, #tpu.memory_space<vmem>>, vector<1x1x128xf32>
    %52 = vector.shape_cast %51 : vector<1x1x128xf32> to vector<1x128xf32>
    %53 = vector.broadcast %50 : f32 to vector<1x128xf32>
    %54 = arith.mulf %53, %52 : vector<1x128xf32>
    %55 = arith.addf %54, %16 : vector<1x128xf32>
    %c0_33 = arith.constant 0 : index
    %c0_34 = arith.constant 0 : index
    %c0_35 = arith.constant 0 : index
    %56 = vector.load %arg2[%c0_33, %c0_34, %c0_35] : memref<9x1x128xf32, #tpu.memory_space<vmem>>, vector<1x1x128xf32>
    %57 = vector.shape_cast %56 : vector<1x1x128xf32> to vector<1x128xf32>
    %58 = arith.mulf %22, %57 : vector<1x128xf32>
    %c1_36 = arith.constant 1 : index
    %c0_37 = arith.constant 0 : index
    %c0_38 = arith.constant 0 : index
    %59 = vector.load %arg2[%c1_36, %c0_37, %c0_38] : memref<9x1x128xf32, #tpu.memory_space<vmem>>, vector<1x1x128xf32>
    %60 = vector.shape_cast %59 : vector<1x1x128xf32> to vector<1x128xf32>
    %61 = arith.mulf %29, %60 : vector<1x128xf32>
    %62 = arith.addf %58, %61 : vector<1x128xf32>
    %c2_39 = arith.constant 2 : index
    %c0_40 = arith.constant 0 : index
    %c0_41 = arith.constant 0 : index
    %63 = vector.load %arg2[%c2_39, %c0_40, %c0_41] : memref<9x1x128xf32, #tpu.memory_space<vmem>>, vector<1x1x128xf32>
    %64 = vector.shape_cast %63 : vector<1x1x128xf32> to vector<1x128xf32>
    %65 = arith.mulf %36, %64 : vector<1x128xf32>
    %66 = arith.addf %62, %65 : vector<1x128xf32>
    %c0_42 = arith.constant 0 : index
    %c0_43 = arith.constant 0 : index
    %c0_44 = arith.constant 0 : index
    %67 = vector.load %arg3[%c0_42, %c0_43, %c0_44] : memref<9x1x128xf32, #tpu.memory_space<vmem>>, vector<1x1x128xf32>
    %68 = vector.shape_cast %67 : vector<1x1x128xf32> to vector<1x128xf32>
    %69 = vector.shape_cast %66 : vector<1x128xf32> to vector<1x1x128xf32>
    tpu.vector_store %arg3[%c0_42, %c0_43, %c0_44], %69 {strides = array<i32>} : memref<9x1x128xf32, #tpu.memory_space<vmem>>, vector<1x1x128xf32>,
    %c3_45 = arith.constant 3 : index
    %c0_46 = arith.constant 0 : index
    %c0_47 = arith.constant 0 : index
    %70 = vector.load %arg2[%c3_45, %c0_46, %c0_47] : memref<9x1x128xf32, #tpu.memory_space<vmem>>, vector<1x1x128xf32>
    %71 = vector.shape_cast %70 : vector<1x1x128xf32> to vector<1x128xf32>
    %72 = arith.mulf %22, %71 : vector<1x128xf32>
    %c4_48 = arith.constant 4 : index
    %c0_49 = arith.constant 0 : index
    %c0_50 = arith.constant 0 : index
    %73 = vector.load %arg2[%c4_48, %c0_49, %c0_50] : memref<9x1x128xf32, #tpu.memory_space<vmem>>, vector<1x1x128xf32>
    %74 = vector.shape_cast %73 : vector<1x1x128xf32> to vector<1x128xf32>
    %75 = arith.mulf %29, %74 : vector<1x128xf32>
    %76 = arith.addf %72, %75 : vector<1x128xf32>
    %c5_51 = arith.constant 5 : index
    %c0_52 = arith.constant 0 : index
    %c0_53 = arith.constant 0 : index
    %77 = vector.load %arg2[%c5_51, %c0_52, %c0_53] : memref<9x1x128xf32, #tpu.memory_space<vmem>>, vector<1x1x128xf32>
    %78 = vector.shape_cast %77 : vector<1x1x128xf32> to vector<1x128xf32>
    %79 = arith.mulf %36, %78 : vector<1x128xf32>
    %80 = arith.addf %76, %79 : vector<1x128xf32>
    %c1_54 = arith.constant 1 : index
    %c0_55 = arith.constant 0 : index
    %c0_56 = arith.constant 0 : index
    %81 = vector.load %arg3[%c1_54, %c0_55, %c0_56] : memref<9x1x128xf32, #tpu.memory_space<vmem>>, vector<1x1x128xf32>
    %82 = vector.shape_cast %81 : vector<1x1x128xf32> to vector<1x128xf32>
    %83 = vector.shape_cast %80 : vector<1x128xf32> to vector<1x1x128xf32>
    tpu.vector_store %arg3[%c1_54, %c0_55, %c0_56], %83 {strides = array<i32>} : memref<9x1x128xf32, #tpu.memory_space<vmem>>, vector<1x1x128xf32>,
    %c6_57 = arith.constant 6 : index
    %c0_58 = arith.constant 0 : index
    %c0_59 = arith.constant 0 : index
    %84 = vector.load %arg2[%c6_57, %c0_58, %c0_59] : memref<9x1x128xf32, #tpu.memory_space<vmem>>, vector<1x1x128xf32>
    %85 = vector.shape_cast %84 : vector<1x1x128xf32> to vector<1x128xf32>
    %86 = arith.mulf %22, %85 : vector<1x128xf32>
    %c7_60 = arith.constant 7 : index
    %c0_61 = arith.constant 0 : index
    %c0_62 = arith.constant 0 : index
    %87 = vector.load %arg2[%c7_60, %c0_61, %c0_62] : memref<9x1x128xf32, #tpu.memory_space<vmem>>, vector<1x1x128xf32>
    %88 = vector.shape_cast %87 : vector<1x1x128xf32> to vector<1x128xf32>
    %89 = arith.mulf %29, %88 : vector<1x128xf32>
    %90 = arith.addf %86, %89 : vector<1x128xf32>
    %c8_63 = arith.constant 8 : index
    %c0_64 = arith.constant 0 : index
    %c0_65 = arith.constant 0 : index
    %91 = vector.load %arg2[%c8_63, %c0_64, %c0_65] : memref<9x1x128xf32, #tpu.memory_space<vmem>>, vector<1x1x128xf32>
    %92 = vector.shape_cast %91 : vector<1x1x128xf32> to vector<1x128xf32>
    %93 = arith.mulf %36, %92 : vector<1x128xf32>
    %94 = arith.addf %90, %93 : vector<1x128xf32>
    %c2_66 = arith.constant 2 : index
    %c0_67 = arith.constant 0 : index
    %c0_68 = arith.constant 0 : index
    %95 = vector.load %arg3[%c2_66, %c0_67, %c0_68] : memref<9x1x128xf32, #tpu.memory_space<vmem>>, vector<1x1x128xf32>
    %96 = vector.shape_cast %95 : vector<1x1x128xf32> to vector<1x128xf32>
    %97 = vector.shape_cast %94 : vector<1x128xf32> to vector<1x1x128xf32>
    tpu.vector_store %arg3[%c2_66, %c0_67, %c0_68], %97 {strides = array<i32>} : memref<9x1x128xf32, #tpu.memory_space<vmem>>, vector<1x1x128xf32>,
    %c0_69 = arith.constant 0 : index
    %c0_70 = arith.constant 0 : index
    %c0_71 = arith.constant 0 : index
    %98 = vector.load %arg2[%c0_69, %c0_70, %c0_71] : memref<9x1x128xf32, #tpu.memory_space<vmem>>, vector<1x1x128xf32>
    %99 = vector.shape_cast %98 : vector<1x1x128xf32> to vector<1x128xf32>
    %100 = arith.mulf %29, %99 : vector<1x128xf32>
    %c1_72 = arith.constant 1 : index
    %c0_73 = arith.constant 0 : index
    %c0_74 = arith.constant 0 : index
    %101 = vector.load %arg2[%c1_72, %c0_73, %c0_74] : memref<9x1x128xf32, #tpu.memory_space<vmem>>, vector<1x1x128xf32>
    %102 = vector.shape_cast %101 : vector<1x1x128xf32> to vector<1x128xf32>
    %103 = arith.mulf %42, %102 : vector<1x128xf32>
    %104 = arith.addf %100, %103 : vector<1x128xf32>
    %c2_75 = arith.constant 2 : index
    %c0_76 = arith.constant 0 : index
    %c0_77 = arith.constant 0 : index
    %105 = vector.load %arg2[%c2_75, %c0_76, %c0_77] : memref<9x1x128xf32, #tpu.memory_space<vmem>>, vector<1x1x128xf32>
    %106 = vector.shape_cast %105 : vector<1x1x128xf32> to vector<1x128xf32>
    %107 = arith.mulf %49, %106 : vector<1x128xf32>
    %108 = arith.addf %104, %107 : vector<1x128xf32>
    %c3_78 = arith.constant 3 : index
    %c0_79 = arith.constant 0 : index
    %c0_80 = arith.constant 0 : index
    %109 = vector.load %arg3[%c3_78, %c0_79, %c0_80] : memref<9x1x128xf32, #tpu.memory_space<vmem>>, vector<1x1x128xf32>
    %110 = vector.shape_cast %109 : vector<1x1x128xf32> to vector<1x128xf32>
    %111 = vector.shape_cast %108 : vector<1x128xf32> to vector<1x1x128xf32>
    tpu.vector_store %arg3[%c3_78, %c0_79, %c0_80], %111 {strides = array<i32>} : memref<9x1x128xf32, #tpu.memory_space<vmem>>, vector<1x1x128xf32>,
    %c3_81 = arith.constant 3 : index
    %c0_82 = arith.constant 0 : index
    %c0_83 = arith.constant 0 : index
    %112 = vector.load %arg2[%c3_81, %c0_82, %c0_83] : memref<9x1x128xf32, #tpu.memory_space<vmem>>, vector<1x1x128xf32>
    %113 = vector.shape_cast %112 : vector<1x1x128xf32> to vector<1x128xf32>
    %114 = arith.mulf %29, %113 : vector<1x128xf32>
    %c4_84 = arith.constant 4 : index
    %c0_85 = arith.constant 0 : index
    %c0_86 = arith.constant 0 : index
    %115 = vector.load %arg2[%c4_84, %c0_85, %c0_86] : memref<9x1x128xf32, #tpu.memory_space<vmem>>, vector<1x1x128xf32>
    %116 = vector.shape_cast %115 : vector<1x1x128xf32> to vector<1x128xf32>
    %117 = arith.mulf %42, %116 : vector<1x128xf32>
    %118 = arith.addf %114, %117 : vector<1x128xf32>
    %c5_87 = arith.constant 5 : index
    %c0_88 = arith.constant 0 : index
    %c0_89 = arith.constant 0 : index
    %119 = vector.load %arg2[%c5_87, %c0_88, %c0_89] : memref<9x1x128xf32, #tpu.memory_space<vmem>>, vector<1x1x128xf32>
    %120 = vector.shape_cast %119 : vector<1x1x128xf32> to vector<1x128xf32>
    %121 = arith.mulf %49, %120 : vector<1x128xf32>
    %122 = arith.addf %118, %121 : vector<1x128xf32>
    %c4_90 = arith.constant 4 : index
    %c0_91 = arith.constant 0 : index
    %c0_92 = arith.constant 0 : index
    %123 = vector.load %arg3[%c4_90, %c0_91, %c0_92] : memref<9x1x128xf32, #tpu.memory_space<vmem>>, vector<1x1x128xf32>
    %124 = vector.shape_cast %123 : vector<1x1x128xf32> to vector<1x128xf32>
    %125 = vector.shape_cast %122 : vector<1x128xf32> to vector<1x1x128xf32>
    tpu.vector_store %arg3[%c4_90, %c0_91, %c0_92], %125 {strides = array<i32>} : memref<9x1x128xf32, #tpu.memory_space<vmem>>, vector<1x1x128xf32>,
    %c6_93 = arith.constant 6 : index
    %c0_94 = arith.constant 0 : index
    %c0_95 = arith.constant 0 : index
    %126 = vector.load %arg2[%c6_93, %c0_94, %c0_95] : memref<9x1x128xf32, #tpu.memory_space<vmem>>, vector<1x1x128xf32>
    %127 = vector.shape_cast %126 : vector<1x1x128xf32> to vector<1x128xf32>
    %128 = arith.mulf %29, %127 : vector<1x128xf32>
    %c7_96 = arith.constant 7 : index
    %c0_97 = arith.constant 0 : index
    %c0_98 = arith.constant 0 : index
    %129 = vector.load %arg2[%c7_96, %c0_97, %c0_98] : memref<9x1x128xf32, #tpu.memory_space<vmem>>, vector<1x1x128xf32>
    %130 = vector.shape_cast %129 : vector<1x1x128xf32> to vector<1x128xf32>
    %131 = arith.mulf %42, %130 : vector<1x128xf32>
    %132 = arith.addf %128, %131 : vector<1x128xf32>
    %c8_99 = arith.constant 8 : index
    %c0_100 = arith.constant 0 : index
    %c0_101 = arith.constant 0 : index
    %133 = vector.load %arg2[%c8_99, %c0_100, %c0_101] : memref<9x1x128xf32, #tpu.memory_space<vmem>>, vector<1x1x128xf32>
    %134 = vector.shape_cast %133 : vector<1x1x128xf32> to vector<1x128xf32>
    %135 = arith.mulf %49, %134 : vector<1x128xf32>
    %136 = arith.addf %132, %135 : vector<1x128xf32>
    %c5_102 = arith.constant 5 : index
    %c0_103 = arith.constant 0 : index
    %c0_104 = arith.constant 0 : index
    %137 = vector.load %arg3[%c5_102, %c0_103, %c0_104] : memref<9x1x128xf32, #tpu.memory_space<vmem>>, vector<1x1x128xf32>
    %138 = vector.shape_cast %137 : vector<1x1x128xf32> to vector<1x128xf32>
    %139 = vector.shape_cast %136 : vector<1x128xf32> to vector<1x1x128xf32>
    tpu.vector_store %arg3[%c5_102, %c0_103, %c0_104], %139 {strides = array<i32>} : memref<9x1x128xf32, #tpu.memory_space<vmem>>, vector<1x1x128xf32>,
    %c0_105 = arith.constant 0 : index
    %c0_106 = arith.constant 0 : index
    %c0_107 = arith.constant 0 : index
    %140 = vector.load %arg2[%c0_105, %c0_106, %c0_107] : memref<9x1x128xf32, #tpu.memory_space<vmem>>, vector<1x1x128xf32>
    %141 = vector.shape_cast %140 : vector<1x1x128xf32> to vector<1x128xf32>
    %142 = arith.mulf %36, %141 : vector<1x128xf32>
    %c1_108 = arith.constant 1 : index
    %c0_109 = arith.constant 0 : index
    %c0_110 = arith.constant 0 : index
    %143 = vector.load %arg2[%c1_108, %c0_109, %c0_110] : memref<9x1x128xf32, #tpu.memory_space<vmem>>, vector<1x1x128xf32>
    %144 = vector.shape_cast %143 : vector<1x1x128xf32> to vector<1x128xf32>
    %145 = arith.mulf %49, %144 : vector<1x128xf32>
    %146 = arith.addf %142, %145 : vector<1x128xf32>
    %c2_111 = arith.constant 2 : index
    %c0_112 = arith.constant 0 : index
    %c0_113 = arith.constant 0 : index
    %147 = vector.load %arg2[%c2_111, %c0_112, %c0_113] : memref<9x1x128xf32, #tpu.memory_space<vmem>>, vector<1x1x128xf32>
    %148 = vector.shape_cast %147 : vector<1x1x128xf32> to vector<1x128xf32>
    %149 = arith.mulf %55, %148 : vector<1x128xf32>
    %150 = arith.addf %146, %149 : vector<1x128xf32>
    %c6_114 = arith.constant 6 : index
    %c0_115 = arith.constant 0 : index
    %c0_116 = arith.constant 0 : index
    %151 = vector.load %arg3[%c6_114, %c0_115, %c0_116] : memref<9x1x128xf32, #tpu.memory_space<vmem>>, vector<1x1x128xf32>
    %152 = vector.shape_cast %151 : vector<1x1x128xf32> to vector<1x128xf32>
    %153 = vector.shape_cast %150 : vector<1x128xf32> to vector<1x1x128xf32>
    tpu.vector_store %arg3[%c6_114, %c0_115, %c0_116], %153 {strides = array<i32>} : memref<9x1x128xf32, #tpu.memory_space<vmem>>, vector<1x1x128xf32>,
    %c3_117 = arith.constant 3 : index
    %c0_118 = arith.constant 0 : index
    %c0_119 = arith.constant 0 : index
    %154 = vector.load %arg2[%c3_117, %c0_118, %c0_119] : memref<9x1x128xf32, #tpu.memory_space<vmem>>, vector<1x1x128xf32>
    %155 = vector.shape_cast %154 : vector<1x1x128xf32> to vector<1x128xf32>
    %156 = arith.mulf %36, %155 : vector<1x128xf32>
    %c4_120 = arith.constant 4 : index
    %c0_121 = arith.constant 0 : index
    %c0_122 = arith.constant 0 : index
    %157 = vector.load %arg2[%c4_120, %c0_121, %c0_122] : memref<9x1x128xf32, #tpu.memory_space<vmem>>, vector<1x1x128xf32>
    %158 = vector.shape_cast %157 : vector<1x1x128xf32> to vector<1x128xf32>
    %159 = arith.mulf %49, %158 : vector<1x128xf32>
    %160 = arith.addf %156, %159 : vector<1x128xf32>
    %c5_123 = arith.constant 5 : index
    %c0_124 = arith.constant 0 : index
    %c0_125 = arith.constant 0 : index
    %161 = vector.load %arg2[%c5_123, %c0_124, %c0_125] : memref<9x1x128xf32, #tpu.memory_space<vmem>>, vector<1x1x128xf32>
    %162 = vector.shape_cast %161 : vector<1x1x128xf32> to vector<1x128xf32>
    %163 = arith.mulf %55, %162 : vector<1x128xf32>
    %164 = arith.addf %160, %163 : vector<1x128xf32>
    %c7_126 = arith.constant 7 : index
    %c0_127 = arith.constant 0 : index
    %c0_128 = arith.constant 0 : index
    %165 = vector.load %arg3[%c7_126, %c0_127, %c0_128] : memref<9x1x128xf32, #tpu.memory_space<vmem>>, vector<1x1x128xf32>
    %166 = vector.shape_cast %165 : vector<1x1x128xf32> to vector<1x128xf32>
    %167 = vector.shape_cast %164 : vector<1x128xf32> to vector<1x1x128xf32>
    tpu.vector_store %arg3[%c7_126, %c0_127, %c0_128], %167 {strides = array<i32>} : memref<9x1x128xf32, #tpu.memory_space<vmem>>, vector<1x1x128xf32>,
    %c6_129 = arith.constant 6 : index
    %c0_130 = arith.constant 0 : index
    %c0_131 = arith.constant 0 : index
    %168 = vector.load %arg2[%c6_129, %c0_130, %c0_131] : memref<9x1x128xf32, #tpu.memory_space<vmem>>, vector<1x1x128xf32>
    %169 = vector.shape_cast %168 : vector<1x1x128xf32> to vector<1x128xf32>
    %170 = arith.mulf %36, %169 : vector<1x128xf32>
    %c7_132 = arith.constant 7 : index
    %c0_133 = arith.constant 0 : index
    %c0_134 = arith.constant 0 : index
    %171 = vector.load %arg2[%c7_132, %c0_133, %c0_134] : memref<9x1x128xf32, #tpu.memory_space<vmem>>, vector<1x1x128xf32>
    %172 = vector.shape_cast %171 : vector<1x1x128xf32> to vector<1x128xf32>
    %173 = arith.mulf %49, %172 : vector<1x128xf32>
    %174 = arith.addf %170, %173 : vector<1x128xf32>
    %c8_135 = arith.constant 8 : index
    %c0_136 = arith.constant 0 : index
    %c0_137 = arith.constant 0 : index
    %175 = vector.load %arg2[%c8_135, %c0_136, %c0_137] : memref<9x1x128xf32, #tpu.memory_space<vmem>>, vector<1x1x128xf32>
    %176 = vector.shape_cast %175 : vector<1x1x128xf32> to vector<1x128xf32>
    %177 = arith.mulf %55, %176 : vector<1x128xf32>
    %178 = arith.addf %174, %177 : vector<1x128xf32>
    %c8_138 = arith.constant 8 : index
    %c0_139 = arith.constant 0 : index
    %c0_140 = arith.constant 0 : index
    %179 = vector.load %arg3[%c8_138, %c0_139, %c0_140] : memref<9x1x128xf32, #tpu.memory_space<vmem>>, vector<1x1x128xf32>
    %180 = vector.shape_cast %179 : vector<1x1x128xf32> to vector<1x128xf32>
    %181 = vector.shape_cast %178 : vector<1x128xf32> to vector<1x1x128xf32>
    tpu.vector_store %arg3[%c8_138, %c0_139, %c0_140], %181 {strides = array<i32>} : memref<9x1x128xf32, #tpu.memory_space<vmem>>, vector<1x1x128xf32>,
    return
  }
  func.func @transform_0(%arg0: i32) -> i32 {
    %c0_i32 = arith.constant 0 : i32
    %c0_i32_0 = arith.constant 0 : i32
    return %c0_i32 : i32
  }
  func.func @transform_1(%arg0: i32) -> (i32, i32, i32) {
    %c0_i32 = arith.constant 0 : i32
    %c0_i32_0 = arith.constant 0 : i32
    %c0_i32_1 = arith.constant 0 : i32
    return %c0_i32, %arg0, %c0_i32_0 : i32, i32, i32
  }
  func.func @transform_2(%arg0: i32) -> (i32, i32, i32) {
    %c0_i32 = arith.constant 0 : i32
    %c0_i32_0 = arith.constant 0 : i32
    %c0_i32_1 = arith.constant 0 : i32
    return %c0_i32, %arg0, %c0_i32_0 : i32, i32, i32
  }
}

</mosaic_0001>

<bundles_post_ra>
// kernel: physics_forward.1
= control target key start
LH: loop header
LB: loop body
LE: loop exit
PB: predicated region body
PF: predicated region fallthrough
CT: control target
= control target key end

     0   :  { %7 = vsyncpa [#allocation3], 0  ;;  %s210_s12 = smov [#allocation2]   ;;  %s371_s0 = inlined_call_operand.vmem [shape: f32[2], index: 0, kind: input, shape index: {}]   ;;  %s372_s1 = inlined_call_operand.vmem [shape: f32[9,1,128], index: 1, kind: input, shape index: {}, may-alias: {1,2}]   ;;  %s373_s2 = inlined_call_operand.vmem [shape: f32[9,1,128], index: 2, kind: output, shape index: {}, may-alias: {1,2}]  }
   0x1   :  { %s13_s11 = sshll.u32 %s371_s0, 4  ;;  %s14_s11 = int_to_ptr.vmem [resolvable:$true] %s13_s11 }
   0x2   :  { %16 = dma.vmem_to_smem %s14_s11, 16, %s210_s12, [#allocation3]  }
   0x3   :  { %208 = dma.done.wait [#allocation3], 16  }
   0x4   :  { %209 = vsyncadd [#allocation3], 4294967280 }
   0x5   :  { %23 = sfence }
   0x6   :  { %s24_s13 = sld [smem:[#allocation2]]  ;;  %v26_v0 = vld [vmem:[%s372_s1] sm:$0x1]  ;;  %v156_v1 = vld [vmem:[%s372_s1 + $0x4] sm:$0x1] }
   0x7   :  { %s155_s18 = sld [smem:[#allocation2 + $0x1]]  ;;  %v29_v2 = vadd.f32 %v156_v1, %v26_v0  ;;  %v157_v3 = vld [vmem:[%s372_s1 + $0x8] sm:$0x1]  ;;  %v159_v4 = vld [vmem:[%s372_s1 + $0x1] sm:$0x1] }
   0x8   :  { %v160_v5 = vld [vmem:[%s372_s1 + $0x3] sm:$0x1]  ;;  %v161_v6 = vld [vmem:[%s372_s1 + $0x2] sm:$0x1]  ;;  %v162_v7 = vld [vmem:[%s372_s1 + $0x6] sm:$0x1] }
   0x9   :  { %v32_v8 = vadd.f32 %v157_v3, %v29_v2  ;;  %v45_v9 = vadd.f32 %v160_v5, %v159_v4  ;;  %v52_v11 = vadd.f32 %v162_v7, %v161_v6  ;;  %v163_v17 = vld [vmem:[%s372_s1 + $0x5] sm:$0x1]  ;;  %v164_v18 = vld [vmem:[%s372_s1 + $0x7] sm:$0x1]  ;;  %v166_v19 = vld [vmem:[%s372_s1 + $0x4] sm:$0x1] }
   0xa   :  { %v170_v23 = vld [vmem:[%s372_s1 + $0x7] sm:$0x1]  ;;  %v165_v25 = vld [vmem:[%s372_s1 + $0x3] sm:$0x1]  ;;  %v167_v26 = vld [vmem:[%s372_s1 + $0x5] sm:$0x1]  ;;  %v60_v28 = vadd.f32 %v164_v18, %v163_v17 }
   0xb   :  { %v158_v10 = vadd.f32 -3.0, %v32_v8  ;;  %v171_v27 = vld [vmem:[%s372_s1 + $0x8] sm:$0x1]  ;;  %v169_v31 = vld [vmem:[%s372_s1 + $0x6] sm:$0x1] }
   0xc   :  { %s36_s28 = smul.f32 2.0, %s24_s13  ;;  %v46_v12 = vstv %s24_s13  ;;  %v180_v32 = vld [vmem:[%s372_s1 + $0x6] sm:$0x1]  ;;  %v181_v33 = vld [vmem:[%s372_s1 + $0x7] sm:$0x1] }
   0xd   :  { %v34_v13 = vstv %s155_s18  ;;  %v250_v14 = vmul.f32 %v46_v12, %v45_v9  ;;  %v261_v21 = vmul.f32 %v52_v11, %v46_v12  ;;  %v61_v45 = vmul.f32 %v60_v28, %v46_v12  ;;  %v182_v46 = vld [vmem:[%s372_s1 + $0x8] sm:$0x1] }
   0xe   :  { %v35_v15 = vmul.f32 %v158_v10, %v34_v13  ;;  %v37_v16 = vstv %s36_s28 }
   0xf   :  { %v39_v20 = vmul.f32 %v37_v16, %v26_v0  ;;  %v54_v22 = vmul.f32 %v156_v1, %v37_v16  ;;  %v65_v29 = vmul.f32 %v159_v4, %v250_v14  ;;  %v73_v30 = vmul.f32 %v166_v19, %v250_v14 }
  0x10   :  { %v38_v24 = vsub.f32 %v35_v15, %v37_v16  ;;  %v83_v35 = vmul.f32 %v170_v23, %v250_v14  ;;  %v111_v37 = vmul.f32 %v180_v32, %v250_v14  ;;  %v67_v38 = vmul.f32 %v161_v6, %v261_v21 }
  0x11   :  { %v76_v39 = vmul.f32 %v167_v26, %v261_v21  ;;  %v86_v40 = vmul.f32 %v171_v27, %v261_v21  ;;  %v116_v51 = vmul.f32 %v182_v46, %v61_v45  ;;  %v62_v56 = vmul.f32 %v157_v3, %v37_v16 }
  0x12   :  { %v40_v34 = vadd.f32 %v39_v20, %v38_v24  ;;  %v55_v36 = vadd.f32 %v54_v22, %v38_v24 }
  0x13   :  { %v63_v58 = vadd.f32 %v62_v56, %v38_v24 }
  0x14   :  { %v64_v41 = vmul.f32 %v40_v34, %v26_v0  ;;  %v71_v42 = vmul.f32 %v165_v25, %v40_v34  ;;  %v81_v43 = vmul.f32 %v169_v31, %v40_v34  ;;  %v113_v44 = vmul.f32 %v181_v33, %v55_v36 }
  0x16   :  { %v66_v47 = vadd.f32 %v65_v29, %v64_v41  ;;  %v74_v48 = vadd.f32 %v73_v30, %v71_v42  ;;  %v84_v49 = vadd.f32 %v83_v35, %v81_v43  ;;  %v114_v50 = vadd.f32 %v113_v44, %v111_v37 }
  0x18   :  { %v68_v52 = vadd.f32 %v67_v38, %v66_v47  ;;  %v77_v53 = vadd.f32 %v76_v39, %v74_v48  ;;  %v87_v54 = vadd.f32 %v86_v40, %v84_v49  ;;  %v117_v55 = vadd.f32 %v116_v51, %v114_v50 }
  0x1a   :  { %69 = vst [vmem:[%s373_s2] sm:$0x1] %v68_v52 }
  0x1b   :  { %168 = vst [vmem:[%s373_s2 + $0x1] sm:$0x1] %v77_v53 }
  0x1c   :  { %172 = vst [vmem:[%s373_s2 + $0x2] sm:$0x1] %v87_v54 }
  0x23   :  { %v178_v57 = vld [vmem:[%s372_s1 + $0x5] sm:$0x1] }
  0x24   :  { %183 = vst [vmem:[%s373_s2 + $0x5] sm:$0x1] %v117_v55  ;;  %v106_v16 = vmul.f32 %v178_v57, %v61_v45 }
  0x2b   :  { %v90_v59 = vld [vmem:[%s372_s1] sm:$0x1]  ;;  %v173_v62 = vld [vmem:[%s372_s1 + $0x1] sm:$0x1]  ;;  %v174_v2 = vld [vmem:[%s372_s1 + $0x2] sm:$0x1] }
  0x2c   :  { %v120_v60 = vld [vmem:[%s372_s1] sm:$0x1]  ;;  %v91_v61 = vmul.f32 %v90_v59, %v250_v14  ;;  %v184_v0 = vld [vmem:[%s372_s1 + $0x1] sm:$0x1]  ;;  %v93_v1 = vmul.f32 %v173_v62, %v55_v36  ;;  %v185_v4 = vld [vmem:[%s372_s1 + $0x2] sm:$0x1]  ;;  %v96_v5 = vmul.f32 %v174_v2, %v61_v45 }
  0x2d   :  { %v121_v63 = vmul.f32 %v120_v60, %v261_v21  ;;  %v123_v3 = vmul.f32 %v184_v0, %v61_v45  ;;  %v126_v6 = vmul.f32 %v185_v4, %v63_v58 }
  0x2e   :  { %v94_v7 = vadd.f32 %v93_v1, %v91_v61 }
  0x2f   :  { %v124_v8 = vadd.f32 %v123_v3, %v121_v63 }
  0x30   :  { %v97_v9 = vadd.f32 %v96_v5, %v94_v7 }
  0x31   :  { %v127_v10 = vadd.f32 %v126_v6, %v124_v8 }
  0x32   :  { %175 = vst [vmem:[%s373_s2 + $0x3] sm:$0x1] %v97_v9 }
  0x33   :  { %186 = vst [vmem:[%s373_s2 + $0x6] sm:$0x1] %v127_v10 }
  0x3a   :  { %v177_v11 = vld [vmem:[%s372_s1 + $0x4] sm:$0x1]  ;;  %v176_v13 = vld [vmem:[%s372_s1 + $0x3] sm:$0x1] }
  0x3b   :  { %v103_v12 = vmul.f32 %v177_v11, %v55_v36  ;;  %v101_v15 = vmul.f32 %v176_v13, %v250_v14 }
  0x3d   :  { %v104_v17 = vadd.f32 %v103_v12, %v101_v15 }
  0x3f   :  { %v107_v18 = vadd.f32 %v106_v16, %v104_v17 }
  0x41   :  { %179 = vst [vmem:[%s373_s2 + $0x4] sm:$0x1] %v107_v18 }
  0x48   :  { %v187_v19 = vld [vmem:[%s372_s1 + $0x3] sm:$0x1]  ;;  %v189_v20 = vld [vmem:[%s372_s1 + $0x5] sm:$0x1]  ;;  %v188_v22 = vld [vmem:[%s372_s1 + $0x4] sm:$0x1] }
  0x49   :  { %v131_v14 = vmul.f32 %v187_v19, %v261_v21  ;;  %v133_v23 = vmul.f32 %v188_v22, %v61_v45  ;;  %v136_v24 = vmul.f32 %v189_v20, %v63_v58 }
  0x4b   :  { %v134_v25 = vadd.f32 %v133_v23, %v131_v14 }
  0x4d   :  { %v137_v26 = vadd.f32 %v136_v24, %v134_v25 }
  0x4f   :  { %190 = vst [vmem:[%s373_s2 + $0x7] sm:$0x1] %v137_v26 }
  0x56   :  { %v191_v27 = vld [vmem:[%s372_s1 + $0x6] sm:$0x1]  ;;  %v193_v28 = vld [vmem:[%s372_s1 + $0x8] sm:$0x1]  ;;  %v192_v29 = vld [vmem:[%s372_s1 + $0x7] sm:$0x1] }
  0x57   :  { %v141_v30 = vmul.f32 %v191_v27, %v261_v21  ;;  %v143_v31 = vmul.f32 %v192_v29, %v61_v45  ;;  %v146_v32 = vmul.f32 %v193_v28, %v63_v58 }
  0x59   :  { %v144_v33 = vadd.f32 %v143_v31, %v141_v30 }
  0x5b   :  { %v147_v34 = vadd.f32 %v146_v32, %v144_v33 }
  0x5d   :  { %194 = vst [vmem:[%s373_s2 + $0x8] sm:$0x1] %v147_v34 }
  0x5e   :  { %154 = vsyncpa [#allocation3], 1 }

</bundles_post_ra>
